<compile_context>
chip_gen: v5e
topology: v5e:2x2
jax: 0.10.0
libtpu: 0.0.40
codegen_flags: <defaults>
</compile_context>

<pallas_src>
import functools

import jax
import jax.numpy as jnp
from jax.experimental import pallas as pl
from jax.experimental.pallas import tpu as pltpu

BATCH_SIZE = 2
SEQ_LEN = 8
HIDDEN_DIM = 32
VOCAB = 10

LANES = 128  # TPU vreg lane width


def _embedding_kernel(idx_ref, table_ref, out_ref, *, vocab):
    # idx_ref:   (TILE_R, G)         int32  — G tokens packed per output row
    # table_ref: (VOCAB_PAD, 128)    f32    — embedding table tiled G× along lanes
    # out_ref:   (TILE_R, 128)       f32    — lane-dense output
    tile_r, lanes = out_ref.shape
    g_count = idx_ref.shape[1]
    h = lanes // g_count

    # Spread the G packed token ids across their H-lane groups:
    #   idx_wide[r, g*H + h] = idx[r, g]
    # G-1 selects against a lane iota; stays on the VPU, no cross-lane traffic.
    lane = jax.lax.broadcasted_iota(jnp.int32, (tile_r, lanes), 1)
    idx_wide = jnp.broadcast_to(idx_ref[:, 0:1], (tile_r, lanes))
    for g in range(1, g_count):
        col = jnp.broadcast_to(idx_ref[:, g : g + 1], (tile_r, lanes))
        idx_wide = jnp.where(lane >= g * h, col, idx_wide)

    # VPU compare-and-select over the (tiny, static) vocab.  Each table row is
    # already lane-replicated G times, so one select fills all 128 lanes.
    # Select directly into the accumulator: each token matches exactly one
    # vocab row, so no add is needed (unmatched = zeros = OOB semantics).
    acc = jnp.zeros((tile_r, lanes), jnp.float32)
    for v in range(vocab):  # unrolled: vocab is a small static constant
        acc = jnp.where(idx_wide == v, table_ref[v : v + 1, :], acc)

    out_ref[...] = acc


def embedding_forward(indices, table):
    """indices: (BATCH, SEQ) int32; table: (VOCAB, H) float32
    returns:  (BATCH, SEQ, H) float32   (== PyTorch .view(BATCH_SIZE, -1, H))"""
    b, s = indices.shape
    vocab, h = table.shape
    assert LANES % h == 0, "lane-dense packing assumes HIDDEN_DIM divides 128"
    g = LANES // h                      # tokens packed per lane-dense row
    n = b * s
    assert n % g == 0, "BATCH*SEQ must be a multiple of 128 // HIDDEN_DIM"
    r_total = n // g

    # One-off host-side prep (tiny; table is effectively a constant):
    #  - tile the table G times along lanes -> each row spans a full vreg
    #  - pad vocab 10 -> 16 so the table block loads unmasked sublanes
    vocab_pad = ((vocab + 7) // 8) * 8
    table_wide = jnp.tile(table.astype(jnp.float32), (1, g))        # (vocab, 128)
    table_wide = jnp.pad(table_wide, ((0, vocab_pad - vocab), (0, 0)))
    idx2d = indices.reshape(r_total, g).astype(jnp.int32)            # (R, G)

    # Tile the row axis; table stays VMEM-resident (constant index_map).
    # 512-row tiles = (512,128) f32 = 256 KiB per buffer; comfortably in VMEM
    # with double buffering and a multiple of the 8-sublane granule.
    tile_r = r_total if r_total <= 512 else 512
    grid_r = pl.cdiv(r_total, tile_r)

    out_wide = pl.pallas_call(
        functools.partial(_embedding_kernel, vocab=vocab),
        out_shape=jax.ShapeDtypeStruct((r_total, LANES), jnp.float32),
        grid_spec=pl.GridSpec(
            grid=(grid_r,),
            in_specs=[
                pl.BlockSpec((tile_r, g), lambda i: (i, 0)),          # indices
                pl.BlockSpec((vocab_pad, LANES), lambda i: (0, 0)),   # table (resident)
            ],
            out_specs=pl.BlockSpec((tile_r, LANES), lambda i: (i, 0)),
        ),
        compiler_params=pltpu.CompilerParams(
            dimension_semantics=("parallel",),
        ),
    )(idx2d, table_wide)

    # (R, 128) row-major is bit-identical to (B*S, H) row-major: free reshape.
    return out_wide.reshape(b, s, h)


if __name__ == "__main__":
    key = jax.random.PRNGKey(0)
    k_table, k_idx = jax.random.split(key)

    # nn.Embedding default init ~ N(0, 1)
    table = jax.random.normal(k_table, (VOCAB, HIDDEN_DIM), dtype=jnp.float32)
    indices = jax.random.randint(
        k_idx, (BATCH_SIZE, SEQ_LEN), 0, VOCAB, dtype=jnp.int32
    )

    out = embedding_forward(indices, table)
    out = jax.block_until_ready(out)

    # Sanity check against plain-JAX reference (table[indices]).
    ref = table[indices]
    assert out.shape == (BATCH_SIZE, SEQ_LEN, HIDDEN_DIM)
    assert jnp.allclose(out, ref, atol=1e-6), "mismatch vs reference gather"

    print("KERNEL_OK")
</pallas_src>

<mosaic_0001>
module attributes {stable_mosaic.version = 11 : i64} {
  func.func @_embedding_kernel(%arg0: i32, %arg1: memref<4x4xi32, #tpu.memory_space<vmem>>, %arg2: memref<16x128xf32, #tpu.memory_space<vmem>>, %arg3: memref<4x128xf32, #tpu.memory_space<vmem>>) attributes {dimension_semantics = [#tpu.dimension_semantics<parallel>], iteration_bounds = array<i64: 1>, scalar_prefetch = 0 : i64, scratch_operands = 0 : i64, tpu.core_type = #tpu.core_type<tc>, window_params = [{transform_indices = @transform_0, window_bounds = array<i64: 4, 4>}, {pipeline_mode = #tpu.pipeline_mode<synchronous>, transform_indices = @transform_1, window_bounds = array<i64: 16, 128>}, {transform_indices = @transform_2, window_bounds = array<i64: 4, 128>}]} {
    %0 = tpu.iota {dimensions = array<i32: 1>} : vector<4x128xi32>
    %c0 = arith.constant 0 : index
    %c0_0 = arith.constant 0 : index
    %1 = vector.load %arg1[%c0, %c0_0] : memref<4x4xi32, #tpu.memory_space<vmem>>, vector<4x1xi32>
    %2 = vector.shape_cast %1 : vector<4x1xi32> to vector<4x1xi32>
    %3 = vector.broadcast %2 : vector<4x1xi32> to vector<4x128xi32>
    %c0_1 = arith.constant 0 : index
    %c1 = arith.constant 1 : index
    %4 = vector.load %arg1[%c0_1, %c1] : memref<4x4xi32, #tpu.memory_space<vmem>>, vector<4x1xi32>
    %5 = vector.shape_cast %4 : vector<4x1xi32> to vector<4x1xi32>
    %6 = vector.broadcast %5 : vector<4x1xi32> to vector<4x128xi32>
    %c32_i32 = arith.constant 32 : i32
    %7 = vector.broadcast %c32_i32 : i32 to vector<4x128xi32>
    %8 = arith.cmpi sge, %0, %7 : vector<4x128xi32>
    %9 = arith.select %8, %6, %3 : vector<4x128xi1>, vector<4x128xi32>
    %c0_2 = arith.constant 0 : index
    %c2 = arith.constant 2 : index
    %10 = vector.load %arg1[%c0_2, %c2] : memref<4x4xi32, #tpu.memory_space<vmem>>, vector<4x1xi32>
    %11 = vector.shape_cast %10 : vector<4x1xi32> to vector<4x1xi32>
    %12 = vector.broadcast %11 : vector<4x1xi32> to vector<4x128xi32>
    %c64_i32 = arith.constant 64 : i32
    %13 = vector.broadcast %c64_i32 : i32 to vector<4x128xi32>
    %14 = arith.cmpi sge, %0, %13 : vector<4x128xi32>
    %15 = arith.select %14, %12, %9 : vector<4x128xi1>, vector<4x128xi32>
    %c0_3 = arith.constant 0 : index
    %c3 = arith.constant 3 : index
    %16 = vector.load %arg1[%c0_3, %c3] : memref<4x4xi32, #tpu.memory_space<vmem>>, vector<4x1xi32>
    %17 = vector.shape_cast %16 : vector<4x1xi32> to vector<4x1xi32>
    %18 = vector.broadcast %17 : vector<4x1xi32> to vector<4x128xi32>
    %c96_i32 = arith.constant 96 : i32
    %19 = vector.broadcast %c96_i32 : i32 to vector<4x128xi32>
    %20 = arith.cmpi sge, %0, %19 : vector<4x128xi32>
    %21 = arith.select %20, %18, %15 : vector<4x128xi1>, vector<4x128xi32>
    %cst = arith.constant 0.000000e+00 : f32
    %22 = vector.broadcast %cst : f32 to vector<4x128xf32>
    %c0_i32 = arith.constant 0 : i32
    %23 = vector.broadcast %c0_i32 : i32 to vector<4x128xi32>
    %24 = arith.cmpi eq, %21, %23 : vector<4x128xi32>
    %c0_4 = arith.constant 0 : index
    %c0_5 = arith.constant 0 : index
    %25 = vector.load %arg2[%c0_4, %c0_5] : memref<16x128xf32, #tpu.memory_space<vmem>>, vector<1x128xf32>
    %26 = vector.shape_cast %25 : vector<1x128xf32> to vector<1x128xf32>
    %27 = vector.broadcast %26 : vector<1x128xf32> to vector<4x128xf32>
    %28 = arith.select %24, %27, %22 : vector<4x128xi1>, vector<4x128xf32>
    %c1_i32 = arith.constant 1 : i32
    %29 = vector.broadcast %c1_i32 : i32 to vector<4x128xi32>
    %30 = arith.cmpi eq, %21, %29 : vector<4x128xi32>
    %c1_6 = arith.constant 1 : index
    %c0_7 = arith.constant 0 : index
    %31 = vector.load %arg2[%c1_6, %c0_7] : memref<16x128xf32, #tpu.memory_space<vmem>>, vector<1x128xf32>
    %32 = vector.shape_cast %31 : vector<1x128xf32> to vector<1x128xf32>
    %33 = vector.broadcast %32 : vector<1x128xf32> to vector<4x128xf32>
    %34 = arith.select %30, %33, %28 : vector<4x128xi1>, vector<4x128xf32>
    %c2_i32 = arith.constant 2 : i32
    %35 = vector.broadcast %c2_i32 : i32 to vector<4x128xi32>
    %36 = arith.cmpi eq, %21, %35 : vector<4x128xi32>
    %c2_8 = arith.constant 2 : index
    %c0_9 = arith.constant 0 : index
    %37 = vector.load %arg2[%c2_8, %c0_9] : memref<16x128xf32, #tpu.memory_space<vmem>>, vector<1x128xf32>
    %38 = vector.shape_cast %37 : vector<1x128xf32> to vector<1x128xf32>
    %39 = vector.broadcast %38 : vector<1x128xf32> to vector<4x128xf32>
    %40 = arith.select %36, %39, %34 : vector<4x128xi1>, vector<4x128xf32>
    %c3_i32 = arith.constant 3 : i32
    %41 = vector.broadcast %c3_i32 : i32 to vector<4x128xi32>
    %42 = arith.cmpi eq, %21, %41 : vector<4x128xi32>
    %c3_10 = arith.constant 3 : index
    %c0_11 = arith.constant 0 : index
    %43 = vector.load %arg2[%c3_10, %c0_11] : memref<16x128xf32, #tpu.memory_space<vmem>>, vector<1x128xf32>
    %44 = vector.shape_cast %43 : vector<1x128xf32> to vector<1x128xf32>
    %45 = vector.broadcast %44 : vector<1x128xf32> to vector<4x128xf32>
    %46 = arith.select %42, %45, %40 : vector<4x128xi1>, vector<4x128xf32>
    %c4_i32 = arith.constant 4 : i32
    %47 = vector.broadcast %c4_i32 : i32 to vector<4x128xi32>
    %48 = arith.cmpi eq, %21, %47 : vector<4x128xi32>
    %c4 = arith.constant 4 : index
    %c0_12 = arith.constant 0 : index
    %49 = vector.load %arg2[%c4, %c0_12] : memref<16x128xf32, #tpu.memory_space<vmem>>, vector<1x128xf32>
    %50 = vector.shape_cast %49 : vector<1x128xf32> to vector<1x128xf32>
    %51 = vector.broadcast %50 : vector<1x128xf32> to vector<4x128xf32>
    %52 = arith.select %48, %51, %46 : vector<4x128xi1>, vector<4x128xf32>
    %c5_i32 = arith.constant 5 : i32
    %53 = vector.broadcast %c5_i32 : i32 to vector<4x128xi32>
    %54 = arith.cmpi eq, %21, %53 : vector<4x128xi32>
    %c5 = arith.constant 5 : index
    %c0_13 = arith.constant 0 : index
    %55 = vector.load %arg2[%c5, %c0_13] : memref<16x128xf32, #tpu.memory_space<vmem>>, vector<1x128xf32>
    %56 = vector.shape_cast %55 : vector<1x128xf32> to vector<1x128xf32>
    %57 = vector.broadcast %56 : vector<1x128xf32> to vector<4x128xf32>
    %58 = arith.select %54, %57, %52 : vector<4x128xi1>, vector<4x128xf32>
    %c6_i32 = arith.constant 6 : i32
    %59 = vector.broadcast %c6_i32 : i32 to vector<4x128xi32>
    %60 = arith.cmpi eq, %21, %59 : vector<4x128xi32>
    %c6 = arith.constant 6 : index
    %c0_14 = arith.constant 0 : index
    %61 = vector.load %arg2[%c6, %c0_14] : memref<16x128xf32, #tpu.memory_space<vmem>>, vector<1x128xf32>
    %62 = vector.shape_cast %61 : vector<1x128xf32> to vector<1x128xf32>
    %63 = vector.broadcast %62 : vector<1x128xf32> to vector<4x128xf32>
    %64 = arith.select %60, %63, %58 : vector<4x128xi1>, vector<4x128xf32>
    %c7_i32 = arith.constant 7 : i32
    %65 = vector.broadcast %c7_i32 : i32 to vector<4x128xi32>
    %66 = arith.cmpi eq, %21, %65 : vector<4x128xi32>
    %c7 = arith.constant 7 : index
    %c0_15 = arith.constant 0 : index
    %67 = vector.load %arg2[%c7, %c0_15] : memref<16x128xf32, #tpu.memory_space<vmem>>, vector<1x128xf32>
    %68 = vector.shape_cast %67 : vector<1x128xf32> to vector<1x128xf32>
    %69 = vector.broadcast %68 : vector<1x128xf32> to vector<4x128xf32>
    %70 = arith.select %66, %69, %64 : vector<4x128xi1>, vector<4x128xf32>
    %c8_i32 = arith.constant 8 : i32
    %71 = vector.broadcast %c8_i32 : i32 to vector<4x128xi32>
    %72 = arith.cmpi eq, %21, %71 : vector<4x128xi32>
    %c8 = arith.constant 8 : index
    %c0_16 = arith.constant 0 : index
    %73 = vector.load %arg2[%c8, %c0_16] : memref<16x128xf32, #tpu.memory_space<vmem>>, vector<1x128xf32>
    %74 = vector.shape_cast %73 : vector<1x128xf32> to vector<1x128xf32>
    %75 = vector.broadcast %74 : vector<1x128xf32> to vector<4x128xf32>
    %76 = arith.select %72, %75, %70 : vector<4x128xi1>, vector<4x128xf32>
    %c9_i32 = arith.constant 9 : i32
    %77 = vector.broadcast %c9_i32 : i32 to vector<4x128xi32>
    %78 = arith.cmpi eq, %21, %77 : vector<4x128xi32>
    %c9 = arith.constant 9 : index
    %c0_17 = arith.constant 0 : index
    %79 = vector.load %arg2[%c9, %c0_17] : memref<16x128xf32, #tpu.memory_space<vmem>>, vector<1x128xf32>
    %80 = vector.shape_cast %79 : vector<1x128xf32> to vector<1x128xf32>
    %81 = vector.broadcast %80 : vector<1x128xf32> to vector<4x128xf32>
    %82 = arith.select %78, %81, %76 : vector<4x128xi1>, vector<4x128xf32>
    %c0_18 = arith.constant 0 : index
    %c0_19 = arith.constant 0 : index
    %83 = vector.load %arg3[%c0_18, %c0_19] : memref<4x128xf32, #tpu.memory_space<vmem>>, vector<4x128xf32>
    tpu.vector_store %arg3[%c0_18, %c0_19], %82 {strides = array<i32>} : memref<4x128xf32, #tpu.memory_space<vmem>>, vector<4x128xf32>,
    return
  }
  func.func @transform_0(%arg0: i32) -> (i32, i32) {
    %c0_i32 = arith.constant 0 : i32
    %c0_i32_0 = arith.constant 0 : i32
    return %arg0, %c0_i32 : i32, i32
  }
  func.func @transform_1(%arg0: i32) -> (i32, i32) {
    %c0_i32 = arith.constant 0 : i32
    %c0_i32_0 = arith.constant 0 : i32
    %c0_i32_1 = arith.constant 0 : i32
    return %c0_i32, %c0_i32_0 : i32, i32
  }
  func.func @transform_2(%arg0: i32) -> (i32, i32) {
    %c0_i32 = arith.constant 0 : i32
    %c0_i32_0 = arith.constant 0 : i32
    return %arg0, %c0_i32 : i32, i32
  }
}

</mosaic_0001>

<bundles_post_ra>
// kernel: tpu_custom_call.1
= control target key start
LH: loop header
LB: loop body
LE: loop exit
PB: predicated region body
PF: predicated region fallthrough
CT: control target
= control target key end

     0   :  { %7 = vsyncpa [#allocation3], 0  ;;  %s257_s0 = inlined_call_operand.hbm [shape: s32[4,4], index: 0, kind: input, shape index: {}]   ;;  %s258_s1 = inlined_call_operand.hbm [shape: f32[16,128], index: 1, kind: input, shape index: {}]   ;;  %s259_s2 = inlined_call_operand.hbm [shape: f32[4,128], index: 2, kind: output, shape index: {}]  }
   0x1   :  { %8 = vsyncpa [#allocation6], 0 }
   0x2   :  { %9 = vsyncpa [#allocation4], 0  ;;  %s15_s11 = sshll.u32 %s257_s0, 4  ;;  %s224_s12 = smov [#allocation2]   ;;  %s16_s11 = int_to_ptr.hbm [resolvable:$true] %s15_s11 }
   0x3   :  { %s17_s13 = sshll.u32 %s224_s12, 4  ;;  %s25_s16 = sshll.u32 %s258_s1, 4  ;;  %s18_s13 = int_to_ptr.vmem [resolvable:$true] %s17_s13  ;;  %s26_s16 = int_to_ptr.hbm [resolvable:$true] %s25_s16 }
   0x4   :  { %20 = dma.hbm_to_vmem [thread:$0]  %s16_s11, 64, %s18_s13, [#allocation3]  }
   0x5   :  { %s225_s17 = smov [#allocation5]   ;;  %s226_s19 = smov 128  }
   0x6   :  { %s27_s18 = sshll.u32 %s225_s17, 4  ;;  %s227_s20 = smov 8   ;;  %s28_s18 = int_to_ptr.vmem [resolvable:$true] %s27_s18 }
   0x7   :  { %33 = dma.hbm_to_vmem [thread:$0]  %s26_s16, 256, %s28_s18, [#allocation6], %s226_s19, %s226_s19, %s227_s20  }
   0x8   :  { %218 = dma.done.wait [#allocation3], 64  }
   0x9   :  { %219 = vsyncadd [#allocation3], 4294967232 }
   0xa   :  { %220 = dma.done.wait [#allocation6], 256  }
   0xb   :  { %221 = vsyncadd [#allocation6], 4294967040  ;;  %v228_v0 = vmov 0   ;;  %v229_v1 = vmov 2   ;;  %v44_v2 = vld [vmem:[#allocation2] sm:$0xf]  ;;  %v42_v5 = vlaneseq }
   0xc   :  { %131 = vset.pattern.permute.xlu0 %v228_v0  ;;  %133 = vset.pattern.permute.xlu1 %v229_v1  ;;  %v230_v3 = vmov 1   ;;  %v231_v4 = vmov 3   ;;  %v136_v12 = vld [vmem:[#allocation5] ss:$0 sm:$0xff]  ;;  %v137_v14 = vld [vmem:[#allocation5 + $0x1] ss:$0 sm:$0xff] }
   0xd   :  { %46 = vperm.xlu0 %131, %v44_v2   ;;  %54 = vperm.xlu1 %133, %v44_v2   ;;  %v43_v8 = vand.u32 127, %v42_v5  ;;  %v138_v16 = vld [vmem:[#allocation5 + $0x2] ss:$0 sm:$0xff]  ;;  %v139_v17 = vld [vmem:[#allocation5 + $0x3] ss:$0 sm:$0xff]  ;;  %s232_s0 = smov [#allocation7]  }
   0xe   :  { %v140_v19 = vld [vmem:[#allocation5 + $0x4] ss:$0 sm:$0xff]  ;;  %v141_v21 = vld [vmem:[#allocation5 + $0x5] ss:$0 sm:$0xff]  ;;  %v142_v23 = vld [vmem:[#allocation5 + $0x6] ss:$0 sm:$0xff] }
   0xf   :  { %vm51_vm0 = vcmp.ge.s32.totalorder %v43_v8, 32  ;;  %vm56_vm1 = vcmp.ge.s32.totalorder %v43_v8, 64  ;;  %vm61_vm2 = vcmp.ge.s32.totalorder %v43_v8, 96  ;;  %v143_v25 = vld [vmem:[#allocation5 + $0x7] ss:$0 sm:$0xff]  ;;  %s109_s1 = sshll.u32 %s232_s0, 4  ;;  %s110_s1 = int_to_ptr.vmem [resolvable:$true] %s109_s1 }
  0x10   :  { %v144_v27 = vld [vmem:[#allocation5 + $0x8] ss:$0 sm:$0xff]  ;;  %v145_v29 = vld [vmem:[#allocation5 + $0x9] ss:$0 sm:$0xff]  ;;  %s111_s23 = sshll.u32 %s259_s2, 4  ;;  %s112_s23 = int_to_ptr.hbm [resolvable:$true] %s111_s23 }
  0x15   :  { %132 = vset.pattern.permute.xlu0 %v230_v3  ;;  %134 = vset.pattern.permute.xlu1 %v231_v4 }
  0x16   :  { %49 = vperm.xlu0 %132, %v44_v2   ;;  %59 = vperm.xlu1 %134, %v44_v2  }
  0x1e   :  { %135 = vset.pattern.permute.xlu0 %v231_v4 }
  0x7f   :  { %v47_v6 = vpop.permute.xlu0 %46  ;;  %v55_v7 = vpop.permute.xlu1 %54 }
  0x88   :  { %v50_v9 = vpop.permute.xlu0 %49  ;;  %v60_v10 = vpop.permute.xlu1 %59 }
  0x89   :  { %v52_v11 = vsel %vm51_vm0, %v50_v9, %v47_v6 }
  0x8a   :  { %v57_v13 = vsel %vm56_vm1, %v55_v7, %v52_v11 }
  0x8b   :  { %v62_v15 = vsel %vm61_vm2, %v60_v10, %v57_v13 }
  0x8c   :  { %vm63_vm3 = vcmp.eq.s32.totalorder %v62_v15, 0  ;;  %vm67_vm4 = vcmp.eq.s32.totalorder %v62_v15, 1  ;;  %vm71_vm5 = vcmp.eq.s32.totalorder %v62_v15, 2  ;;  %vm75_vm6 = vcmp.eq.s32.totalorder %v62_v15, 3 }
  0x8d   :  { %v66_v18 = vsel %vm63_vm3, %v136_v12, 0.0  ;;  %vm79_vm7 = vcmp.eq.s32.totalorder %v62_v15, 4  ;;  %vm83_vm8 = vcmp.eq.s32.totalorder %v62_v15, 5  ;;  %vm87_vm9 = vcmp.eq.s32.totalorder %v62_v15, 6 }
  0x8e   :  { %v70_v20 = vsel %vm67_vm4, %v137_v14, %v66_v18  ;;  %vm91_vm10 = vcmp.eq.s32.totalorder %v62_v15, 7  ;;  %vm95_vm11 = vcmp.eq.s32.totalorder %v62_v15, 8  ;;  %vm99_vm12 = vcmp.eq.s32.totalorder %v62_v15, 9 }
  0x8f   :  { %v74_v22 = vsel %vm71_vm5, %v138_v16, %v70_v20 }
  0x90   :  { %v78_v24 = vsel %vm75_vm6, %v139_v17, %v74_v22 }
  0x91   :  { %v82_v26 = vsel %vm79_vm7, %v140_v19, %v78_v24 }
  0x92   :  { %v86_v28 = vsel %vm83_vm8, %v141_v21, %v82_v26 }
  0x93   :  { %v90_v30 = vsel %vm87_vm9, %v142_v23, %v86_v28 }
  0x94   :  { %v94_v31 = vsel %vm91_vm10, %v143_v25, %v90_v30 }
  0x95   :  { %v98_v32 = vsel %vm95_vm11, %v144_v27, %v94_v31 }
  0x96   :  { %v102_v33 = vsel %vm99_vm12, %v145_v29, %v98_v32 }
  0x97   :  { %103 = vst [vmem:[#allocation7] sm:$0xf] %v102_v33 }
  0x98   :  { %114 = dma.vmem_to_hbm [thread:$0]  %s110_s1, 64, %s112_s23, [#allocation4]  }
  0x99   :  { %222 = dma.done.wait [#allocation4], 64  }
  0x9a   :  { %223 = vsyncadd [#allocation4], 4294967232 }
  0x9b   :  { %119 = vsyncpa [#allocation3], 1 }
  0x9c   :  { %120 = vsyncpa [#allocation6], 1 }
  0x9d   :  { %121 = vsyncpa [#allocation4], 1 }

</bundles_post_ra>
